<compile_context>
chip_gen: v5e
topology: v5e:2x2
jax: 0.10.0
libtpu: 0.0.40
codegen_flags: <defaults>
</compile_context>

<pallas_src>
import jax
import jax.numpy as jnp
from jax import lax
from jax.experimental import pallas as pl
from jax.experimental.pallas import tpu as pltpu

EPS = 1e-5  # nn.LayerNorm default


def prenorm_kernel(x_ref, gamma_ref, beta_ref, w_ref, b_ref, o_ref, y_ref):
    # x: (tile_n, D) input dtype | gamma/beta: (1, D) f32
    # w: (D, tile_h) bf16        | b: (1, tile_h) f32 | o: (tile_n, tile_h)
    # y: (tile_n, D) bf16 VMEM scratch — normalized activations, reused across j.

    @pl.when(pl.program_id(1) == 0)
    def _compute_layernorm():
        x = x_ref[...].astype(jnp.float32)
        # LayerNorm over last (channel) axis, f32 statistics, biased variance.
        mean = jnp.mean(x, axis=-1, keepdims=True)
        centered = x - mean
        var = jnp.mean(centered * centered, axis=-1, keepdims=True)
        xhat = centered * lax.rsqrt(var + EPS)
        y = xhat * gamma_ref[...] + beta_ref[...]
        y_ref[...] = y.astype(jnp.bfloat16)

    # fn(normalized): fused Linear on the MXU (bf16 inputs, f32 accumulate).
    out = jnp.dot(y_ref[...], w_ref[...], preferred_element_type=jnp.float32)
    o_ref[...] = (out + b_ref[...]).astype(o_ref.dtype)


def _vmem_budget_bytes() -> int:
    """Generation-aware VMEM budget (leave headroom for internal scratch)."""
    try:
        cap = pltpu.get_tpu_info().vmem_capacity_bytes
    except Exception:  # fallback if the query is unavailable
        cap = 64 << 20
    return (cap * 3) // 4  # ~96 MiB on v5e/v6e, ~48 MiB on v7x


def prenorm_linear(x, gamma, beta, w, b, *, tile_n=256):
    """x: (batch, seq, dim) -> (batch, seq, hidden). LN over dim, then Linear.

    `w` should already be bf16 (cast hoisted to the caller / cached); f32 is
    accepted but incurs a per-call cast.
    """
    batch, seq, dim = x.shape
    hidden = w.shape[1]
    n = batch * seq
    out_dtype = x.dtype

    x2d = x.reshape(n, dim)
    gamma2d = gamma.reshape(1, dim).astype(jnp.float32)
    beta2d = beta.reshape(1, dim).astype(jnp.float32)
    b2d = b.reshape(1, hidden).astype(jnp.float32)
    w_bf16 = w if w.dtype == jnp.bfloat16 else w.astype(jnp.bfloat16)

    # Row tiling: 256 rows keeps the MXU (128x128 on v5e, 256x256 on v6e/v7x)
    # fed; for small problems use the whole row dim as a single block.
    tile_n = min(tile_n, n)

    x_isz = x2d.dtype.itemsize
    o_isz = jnp.dtype(out_dtype).itemsize
    budget = _vmem_budget_bytes()

    def vmem_bytes(th):
        return (2 * tile_n * dim * x_isz          # x block (double-buffered)
                + 2 * 2 * dim * 4                 # gamma / beta
                + 2 * dim * th * 2                # W block (bf16)
                + 2 * th * 4                      # bias block
                + 2 * tile_n * th * o_isz         # out block
                + tile_n * dim * 2)               # y scratch (bf16)

    # Prefer W fully resident (fetched from HBM exactly once).
    tile_h = hidden
    if vmem_bytes(tile_h) > budget:
        th = max((hidden // 128) * 128, 128)
        while th > 128 and vmem_bytes(th) > budget:
            th -= 128
        tile_h = min(th, hidden)

    grid_i = pl.cdiv(n, tile_n)
    grid_j = pl.cdiv(hidden, tile_h)

    # Actual HBM traffic under this loop order: x fetched once per row tile,
    # W fetched once if resident else once per (i, j) step.
    w_block_bytes = dim * tile_h * 2
    w_bytes = w_block_bytes * (1 if grid_j == 1 else grid_i * grid_j)
    cost = pl.CostEstimate(
        flops=2 * n * dim * hidden,
        transcendentals=n,  # one rsqrt per row
        bytes_accessed=(n * dim * x_isz            # x
                        + w_bytes                  # W (possibly re-fetched)
                        + n * hidden * o_isz       # out
                        + 2 * dim * 4 + hidden * 4),
    )

    out = pl.pallas_call(
        prenorm_kernel,
        out_shape=jax.ShapeDtypeStruct((n, hidden), out_dtype),
        grid_spec=pltpu.PrefetchScalarGridSpec(
            num_scalar_prefetch=0,
            grid=(grid_i, grid_j),
            in_specs=[
                pl.BlockSpec((tile_n, dim), lambda i, j: (i, 0)),   # x rows
                pl.BlockSpec((1, dim), lambda i, j: (0, 0)),        # gamma
                pl.BlockSpec((1, dim), lambda i, j: (0, 0)),        # beta
                pl.BlockSpec((dim, tile_h), lambda i, j: (0, j)),   # W tile
                pl.BlockSpec((1, tile_h), lambda i, j: (0, j)),     # bias tile
            ],
            out_specs=pl.BlockSpec((tile_n, tile_h), lambda i, j: (i, j)),
            scratch_shapes=[pltpu.VMEM((tile_n, dim), jnp.bfloat16)],
        ),
        compiler_params=pltpu.CompilerParams(
            dimension_semantics=("parallel", "arbitrary"),
            vmem_limit_bytes=budget),
        cost_estimate=cost,
    )(x2d, gamma2d, beta2d, w_bf16, b2d)

    return out.reshape(batch, seq, hidden)


def reference(x, gamma, beta, w, b):
    xf = x.astype(jnp.float32)
    mean = jnp.mean(xf, axis=-1, keepdims=True)
    var = jnp.mean((xf - mean) ** 2, axis=-1, keepdims=True)
    y = (xf - mean) / jnp.sqrt(var + EPS) * gamma + beta
    return (y @ w + b).astype(x.dtype)


if __name__ == "__main__":
    # Small but lane-dense shapes (dim / hidden multiples of 128).
    batch, seq, dim, hidden = 2, 8, 128, 128

    key = jax.random.PRNGKey(0)
    kx, kg, kb, kw, kwb = jax.random.split(key, 5)

    x = jax.random.normal(kx, (batch, seq, dim), dtype=jnp.float32)

    # nn.LayerNorm defaults are weight=1, bias=0; perturb so scale/shift are exercised.
    gamma = jnp.ones((dim,), jnp.float32) + 0.01 * jax.random.normal(kg, (dim,))
    beta = 0.01 * jax.random.normal(kb, (dim,))
    w = jax.random.normal(kw, (dim, hidden), dtype=jnp.float32) * (1.0 / dim) ** 0.5
    b = 0.01 * jax.random.normal(kwb, (hidden,))

    # Weight cast hoisted out of the wrapper (cached across calls in real use).
    w_bf16 = w.astype(jnp.bfloat16)

    out = prenorm_linear(x, gamma, beta, w_bf16, b)
    jax.block_until_ready(out)

    # Compare against f32 reference using the same (bf16-quantized) weights;
    # tolerance covers bf16 MXU inputs with f32 accumulation.
    ref = reference(x, gamma, beta, w_bf16.astype(jnp.float32), b)
    assert out.shape == (batch, seq, hidden)
    assert jnp.allclose(out, ref, atol=2e-2, rtol=2e-2), "mismatch vs reference"

    print("KERNEL_OK")
</pallas_src>

<mosaic_0001>
module attributes {stable_mosaic.version = 11 : i64} {
  func.func @prenorm_kernel(%arg0: i32, %arg1: i32, %arg2: memref<16x128xf32, #tpu.memory_space<vmem>>, %arg3: memref<1x128xf32, #tpu.memory_space<vmem>>, %arg4: memref<1x128xf32, #tpu.memory_space<vmem>>, %arg5: memref<128x128xbf16, #tpu.memory_space<vmem>>, %arg6: memref<1x128xf32, #tpu.memory_space<vmem>>, %arg7: memref<16x128xf32, #tpu.memory_space<vmem>>, %arg8: memref<16x128xbf16, #tpu.memory_space<vmem>>) attributes {dimension_semantics = [#tpu.dimension_semantics<parallel>, #tpu.dimension_semantics<arbitrary>], iteration_bounds = array<i64: 1, 1>, scalar_prefetch = 0 : i64, scratch_operands = 1 : i64, tpu.core_type = #tpu.core_type<tc>, window_params = [{transform_indices = @transform_0, window_bounds = array<i64: 16, 128>}, {pipeline_mode = #tpu.pipeline_mode<synchronous>, transform_indices = @transform_1, window_bounds = array<i64: 1, 128>}, {pipeline_mode = #tpu.pipeline_mode<synchronous>, transform_indices = @transform_2, window_bounds = array<i64: 1, 128>}, {transform_indices = @transform_3, window_bounds = array<i64: 128, 128>}, {transform_indices = @transform_4, window_bounds = array<i64: 1, 128>}, {transform_indices = @transform_5, window_bounds = array<i64: 16, 128>}]} {
    %c0_i32 = arith.constant 0 : i32
    %0 = arith.cmpi eq, %arg1, %c0_i32 : i32
    %1 = arith.extui %0 : i1 to i32
    %c0_i32_0 = arith.constant 0 : i32
    %2 = arith.cmpi ne, %1, %c0_i32_0 : i32
    scf.if %2 {
      %c0_8 = arith.constant 0 : index
      %c0_9 = arith.constant 0 : index
      %10 = vector.load %arg2[%c0_8, %c0_9] : memref<16x128xf32, #tpu.memory_space<vmem>>, vector<16x128xf32>
      %cst_10 = arith.constant dense<0.000000e+00> : vector<16xf32>
      %11 = vector.multi_reduction <add>, %10, %cst_10 [1] : vector<16x128xf32> to vector<16xf32>
      %12 = vector.shape_cast %11 : vector<16xf32> to vector<16x1xf32>
      %cst_11 = arith.constant 1.280000e+02 : f32
      %13 = vector.broadcast %cst_11 : f32 to vector<16x1xf32>
      %14 = arith.divf %12, %13 : vector<16x1xf32>
      %15 = vector.broadcast %14 : vector<16x1xf32> to vector<16x128xf32>
      %16 = arith.subf %10, %15 : vector<16x128xf32>
      %17 = arith.mulf %16, %16 : vector<16x128xf32>
      %cst_12 = arith.constant dense<0.000000e+00> : vector<16xf32>
      %18 = vector.multi_reduction <add>, %17, %cst_12 [1] : vector<16x128xf32> to vector<16xf32>
      %19 = vector.shape_cast %18 : vector<16xf32> to vector<16x1xf32>
      %cst_13 = arith.constant 1.280000e+02 : f32
      %20 = vector.broadcast %cst_13 : f32 to vector<16x1xf32>
      %21 = arith.divf %19, %20 : vector<16x1xf32>
      %cst_14 = arith.constant 9.99999974E-6 : f32
      %22 = vector.broadcast %cst_14 : f32 to vector<16x1xf32>
      %23 = arith.addf %21, %22 : vector<16x1xf32>
      %24 = math.rsqrt %23 : vector<16x1xf32>
      %25 = vector.broadcast %24 : vector<16x1xf32> to vector<16x128xf32>
      %26 = arith.mulf %16, %25 : vector<16x128xf32>
      %c0_15 = arith.constant 0 : index
      %c0_16 = arith.constant 0 : index
      %27 = vector.load %arg3[%c0_15, %c0_16] : memref<1x128xf32, #tpu.memory_space<vmem>>, vector<1x128xf32>
      %28 = vector.broadcast %27 : vector<1x128xf32> to vector<16x128xf32>
      %29 = arith.mulf %26, %28 : vector<16x128xf32>
      %c0_17 = arith.constant 0 : index
      %c0_18 = arith.constant 0 : index
      %30 = vector.load %arg4[%c0_17, %c0_18] : memref<1x128xf32, #tpu.memory_space<vmem>>, vector<1x128xf32>
      %31 = vector.broadcast %30 : vector<1x128xf32> to vector<16x128xf32>
      %32 = arith.addf %29, %31 : vector<16x128xf32>
      %33 = arith.truncf %32 : vector<16x128xf32> to vector<16x128xbf16>
      %c0_19 = arith.constant 0 : index
      %c0_20 = arith.constant 0 : index
      %34 = vector.load %arg8[%c0_19, %c0_20] : memref<16x128xbf16, #tpu.memory_space<vmem>>, vector<16x128xbf16>
      tpu.vector_store %arg8[%c0_19, %c0_20], %33 {strides = array<i32>} : memref<16x128xbf16, #tpu.memory_space<vmem>>, vector<16x128xbf16>,
    } else {
    }
    %c0 = arith.constant 0 : index
    %c0_1 = arith.constant 0 : index
    %3 = vector.load %arg8[%c0, %c0_1] : memref<16x128xbf16, #tpu.memory_space<vmem>>, vector<16x128xbf16>
    %c0_2 = arith.constant 0 : index
    %c0_3 = arith.constant 0 : index
    %4 = vector.load %arg5[%c0_2, %c0_3] : memref<128x128xbf16, #tpu.memory_space<vmem>>, vector<128x128xbf16>
    %cst = arith.constant dense<0.000000e+00> : vector<16x128xf32>
    %5 = tpu.matmul %3, %4, %cst {dimension_numbers = #tpu.dot_dimension_numbers<[1], [0], [0], [1], [0, 0, 1, 1], [], []>} : vector<16x128xbf16>, vector<128x128xbf16>, vector<16x128xf32> -> vector<16x128xf32>
    %c0_4 = arith.constant 0 : index
    %c0_5 = arith.constant 0 : index
    %6 = vector.load %arg6[%c0_4, %c0_5] : memref<1x128xf32, #tpu.memory_space<vmem>>, vector<1x128xf32>
    %7 = vector.broadcast %6 : vector<1x128xf32> to vector<16x128xf32>
    %8 = arith.addf %5, %7 : vector<16x128xf32>
    %c0_6 = arith.constant 0 : index
    %c0_7 = arith.constant 0 : index
    %9 = vector.load %arg7[%c0_6, %c0_7] : memref<16x128xf32, #tpu.memory_space<vmem>>, vector<16x128xf32>
    tpu.vector_store %arg7[%c0_6, %c0_7], %8 {strides = array<i32>} : memref<16x128xf32, #tpu.memory_space<vmem>>, vector<16x128xf32>,
    return
  }
  func.func @transform_0(%arg0: i32, %arg1: i32) -> (i32, i32) {
    %c0_i32 = arith.constant 0 : i32
    %c0_i32_0 = arith.constant 0 : i32
    return %arg0, %c0_i32 : i32, i32
  }
  func.func @transform_1(%arg0: i32, %arg1: i32) -> (i32, i32) {
    %c0_i32 = arith.constant 0 : i32
    %c0_i32_0 = arith.constant 0 : i32
    %c0_i32_1 = arith.constant 0 : i32
    return %c0_i32, %c0_i32_0 : i32, i32
  }
  func.func @transform_2(%arg0: i32, %arg1: i32) -> (i32, i32) {
    %c0_i32 = arith.constant 0 : i32
    %c0_i32_0 = arith.constant 0 : i32
    %c0_i32_1 = arith.constant 0 : i32
    return %c0_i32, %c0_i32_0 : i32, i32
  }
  func.func @transform_3(%arg0: i32, %arg1: i32) -> (i32, i32) {
    %c0_i32 = arith.constant 0 : i32
    %c0_i32_0 = arith.constant 0 : i32
    return %c0_i32, %arg1 : i32, i32
  }
  func.func @transform_4(%arg0: i32, %arg1: i32) -> (i32, i32) {
    %c0_i32 = arith.constant 0 : i32
    %c0_i32_0 = arith.constant 0 : i32
    return %c0_i32, %arg1 : i32, i32
  }
  func.func @transform_5(%arg0: i32, %arg1: i32) -> (i32, i32) {
    %c0_i32 = arith.constant 0 : i32
    return %arg0, %arg1 : i32, i32
  }
}

</mosaic_0001>

<bundles_post_ra>
// kernel: tpu_custom_call.1
= control target key start
LH: loop header
LB: loop body
LE: loop exit
PB: predicated region body
PF: predicated region fallthrough
CT: control target
= control target key end

     0   :  { %10 = vsyncpa [#allocation4], 0  ;;  %s480_s0 = inlined_call_operand.hbm [shape: f32[16,128], index: 0, kind: input, shape index: {}]   ;;  %s481_s1 = inlined_call_operand.hbm [shape: f32[1,128], index: 1, kind: input, shape index: {}]   ;;  %s482_s2 = inlined_call_operand.vmem [shape: f32[1,128], index: 2, kind: input, shape index: {}]   ;;  %s483_s3 = inlined_call_operand.hbm [shape: bf16[128,128], index: 3, kind: input, shape index: {}]   ;;  %s484_s4 = inlined_call_operand.vmem [shape: f32[1,128], index: 4, kind: input, shape index: {}]   ;;  %s485_s5 = inlined_call_operand.hbm [shape: f32[16,128], index: 5, kind: output, shape index: {}]  }
   0x1   :  { %11 = vsyncpa [#allocation7], 0  ;;  %s31_s20 = sshll.u32 %s481_s1, 4  ;;  %s32_s20 = int_to_ptr.hbm [resolvable:$true] %s31_s20 }
   0x2   :  { %12 = vsyncpa [#allocation5], 0  ;;  %s417_s21 = smov [#allocation6]   ;;  %s17_s25 = sshll.u32 %s480_s0, 4  ;;  %s18_s25 = int_to_ptr.hbm [resolvable:$true] %s17_s25 }
   0x3   :  { %s33_s22 = sshll.u32 %s417_s21, 4  ;;  %s418_s26 = smov [#allocation3]   ;;  %s34_s22 = int_to_ptr.vmem [resolvable:$true] %s33_s22 }
   0x4   :  { %36 = dma.hbm_to_vmem [thread:$0]  %s32_s20, 16, %s34_s22, [#allocation7]  }
   0x5   :  { %s19_s27 = sshll.u32 %s418_s26, 4  ;;  %s419_s28 = smov 128   ;;  %s20_s27 = int_to_ptr.vmem [resolvable:$true] %s19_s27 }
   0x6   :  { %s420_s29 = smov 8   ;;  %s43_s6 = sshll.u32 %s483_s3, 4  ;;  %s44_s6 = int_to_ptr.hbm [resolvable:$true] %s43_s6 }
   0x7   :  { %25 = dma.hbm_to_vmem [thread:$0]  %s18_s25, 256, %s20_s27, [#allocation4], %s419_s28, %s419_s28, %s420_s29  }
   0x8   :  { %s421_s7 = smov [#allocation8]   ;;  %s422_s0 = smov 64  }
   0x9   :  { %s45_s8 = sshll.u32 %s421_s7, 4  ;;  %s423_s9 = smov 4   ;;  %s46_s8 = int_to_ptr.vmem [resolvable:$true] %s45_s8 }
   0xa   :  { %51 = dma.hbm_to_vmem [thread:$0]  %s44_s6, 1024, %s46_s8, [#allocation7], %s422_s0, %s422_s0, %s423_s9  }
   0xb   :  { %411 = dma.done.wait [#allocation4], 256  }
   0xc   :  { %412 = vsyncadd [#allocation4], 4294967040 }
   0xd   :  { %413 = dma.done.wait [#allocation7], 1040  }
   0xe   :  { %414 = vsyncadd [#allocation7], 4294966256  ;;  %v70_v0 = vld [vmem:[#allocation3] sm:$0xff]  ;;  %v71_v1 = vld [vmem:[#allocation3 + $0x8] sm:$0xff]  ;;  %v424_v2 = vmov 128.0   ;;  %s425_s13 = smov [#allocation9]  }
   0xf   :  { %72 = vadd.xlane.f32.xlu0 %v70_v0  ;;  %309 = vrcp.f32 %v424_v2  ;;  %v291_v17 = vld [vmem:[#allocation8 + $0x38] sm:$0xff]  ;;  %v290_v18 = vld [vmem:[#allocation8 + $0x30] sm:$0xff]  ;;  %v289_v19 = vld [vmem:[#allocation8 + $0x28] sm:$0xff]  ;;  %s231_s14 = sshll.u32 %s425_s13, 4  ;;  %s233_s16 = sshll.u32 %s485_s5, 4  ;;  %s232_s14 = int_to_ptr.vmem [resolvable:$true] %s231_s14  ;;  %s234_s16 = int_to_ptr.hbm [resolvable:$true] %s233_s16 }
  0x10   :  { %211 = vmatpush.bf16.msra.mxu0 %v291_v17  ;;  %v288_v20 = vld [vmem:[#allocation8 + $0x20] sm:$0xff]  ;;  %v287_v21 = vld [vmem:[#allocation8 + $0x18] sm:$0xff]  ;;  %v286_v25 = vld [vmem:[#allocation8 + $0x10] sm:$0xff] }
  0x11   :  { %v285_v26 = vld [vmem:[#allocation8 + $0x8] sm:$0xff]  ;;  %v284_v29 = vld [vmem:[#allocation8] sm:$0xff]  ;;  %v306_v43 = vld [vmem:[#allocation6] ss:$0 sm:$0xff] }
  0x12   :  { %v307_v47 = vld [vmem:[%s482_s2] ss:$0 sm:$0xff] }
  0x13   :  { %v308_v55 = vld [vmem:[%s484_s4] ss:$0 sm:$0xff] }
  0x14   :  { %212 = vmatpush.bf16.msra.mxu0 %v290_v18 }
  0x15   :  { %v310_v3 = vpop.eup %309 }
  0x16   :  { %v77_v4 = vmul.f32 128.0, %v310_v3  ;;  %vm81_vm0 = vweird.f32 %v310_v3 }
  0x17   :  { %74 = vadd.xlane.f32.xlu0 %v71_v1 }
  0x18   :  { %v78_v5 = vsub.f32 1.0, %v77_v4  ;;  %213 = vmatpush.bf16.msra.mxu0 %v289_v19 }
  0x1a   :  { %v79_v6 = vmul.f32 %v310_v3, %v78_v5 }
  0x1c   :  { %v80_v7 = vadd.f32 %v310_v3, %v79_v6  ;;  %214 = vmatpush.bf16.msra.mxu0 %v288_v20 }
  0x1e   :  { %v82_v8 = vsel %vm81_vm0, %v310_v3, %v80_v7 }
  0x20   :  { %215 = vmatpush.bf16.msra.mxu0 %v287_v21 }
  0x24   :  { %216 = vmatpush.bf16.msra.mxu0 %v286_v25 }
  0x28   :  { %217 = vmatpush.bf16.msra.mxu0 %v285_v26 }
  0x2c   :  { %218 = vmatpush.bf16.msra.mxu0 %v284_v29 }
  0x82   :  { %v73_v9 = vpop.xlane.xlu0 %72 }
  0x83   :  { %v83_v10 = vmul.f32 %v82_v8, %v73_v9 }
  0x85   :  { %v85_v11 = vsub.f32 %v70_v0, %v83_v10 }
  0x87   :  { %v87_v12 = vmul.f32 %v85_v11, %v85_v11 }
  0x89   :  { %89 = vadd.xlane.f32.xlu1 %v87_v12 }
  0x8a   :  { %v75_v13 = vpop.xlane.xlu0 %74 }
  0x8b   :  { %v84_v14 = vmul.f32 %v82_v8, %v75_v13 }
  0x8d   :  { %v86_v15 = vsub.f32 %v71_v1, %v84_v14 }
  0x8f   :  { %v88_v16 = vmul.f32 %v86_v15, %v86_v15 }
  0x91   :  { %91 = vadd.xlane.f32.xlu1 %v88_v16 }
  0xfc   :  { %v90_v22 = vpop.xlane.xlu1 %89 }
  0xfd   :  { %v93_v23 = vmul.f32 %v90_v22, %v82_v8 }
  0xff   :  { %v95_v24 = vadd.f32 1e-05, %v93_v23 }
 0x101   :  { %311 = vrsqrt.f32 %v95_v24  ;;  %vm103_vm2 = vweird.f32 %v95_v24 }
 0x104   :  { %v92_v27 = vpop.xlane.xlu1 %91 }
 0x105   :  { %v94_v28 = vmul.f32 %v92_v27, %v82_v8 }
 0x107   :  { %v312_v30 = vpop.eup %311  ;;  %v96_v31 = vadd.f32 1e-05, %v94_v28 }
 0x108   :  { %v98_v32 = vmul.f32 %v312_v30, %v95_v24  ;;  %vm104_vm1 = vweird.f32 %v312_v30 }
 0x109   :  { %313 = vrsqrt.f32 %v96_v31  ;;  %vm105_vm3 = vmor %vm103_vm2, %vm104_vm1  ;;  %vm113_vm5 = vweird.f32 %v96_v31 }
 0x10a   :  { %v99_v33 = vmul.f32 %v312_v30, %v98_v32 }
 0x10c   :  { %v100_v34 = vmul.f32 0.5, %v99_v33 }
 0x10e   :  { %v101_v35 = vsub.f32 1.5, %v100_v34 }
 0x10f   :  { %v314_v36 = vpop.eup %313 }
 0x110   :  { %v102_v37 = vmul.f32 %v312_v30, %v101_v35  ;;  %v108_v38 = vmul.f32 %v314_v36, %v96_v31  ;;  %vm114_vm4 = vweird.f32 %v314_v36 }
 0x111   :  { %vm115_vm6 = vmor %vm113_vm5, %vm114_vm4 }
 0x112   :  { %v109_v39 = vmul.f32 %v314_v36, %v108_v38  ;;  %v106_v40 = vsel %vm105_vm3, %v312_v30, %v102_v37 }
 0x113   :  { %v117_v44 = vmul.f32 %v106_v40, %v85_v11 }
 0x114   :  { %v110_v41 = vmul.f32 0.5, %v109_v39 }
 0x115   :  { %v123_v48 = vmul.f32 %v306_v43, %v117_v44 }
 0x116   :  { %v111_v42 = vsub.f32 1.5, %v110_v41 }
 0x117   :  { %v129_v51 = vadd.f32 %v307_v47, %v123_v48 }
 0x118   :  { %v112_v45 = vmul.f32 %v314_v36, %v111_v42 }
 0x11a   :  { %v116_v46 = vsel %vm115_vm6, %v314_v36, %v112_v45 }
 0x11b   :  { %v118_v49 = vmul.f32 %v116_v46, %v86_v15 }
 0x11d   :  { %v124_v50 = vmul.f32 %v306_v43, %v118_v49 }
 0x11f   :  { %v130_v52 = vadd.f32 %v307_v47, %v124_v50 }
 0x121   :  { %v295_v53 = vpack.c.bf16 %v130_v52, %v129_v51 }
 0x123   :  { %296 = vst [vmem:[#allocation2] sm:$0xff] %v295_v53  }
 0x12a   :  { %v283_v54 = vld [vmem:[#allocation2] sm:$0xff] }
 0x12b   :  { %219 = vmatmul.bf16.vlgmr.msra.gmra.mxu0 %v283_v54 }
 0x1a8   :  { %v220_v56 = vpop.f32.mrf.mxu0 }
 0x1a9   :  { %v221_v57 = vadd.f32 %v308_v55, %v220_v56 }
 0x1ab   :  { %225 = vst [vmem:[#allocation9] sm:$0xff] %v221_v57 }
 0x1b0   :  { %v222_v58 = vpop.f32.mrf.mxu0 }
 0x1b1   :  { %v223_v59 = vadd.f32 %v308_v55, %v222_v58 }
 0x1b3   :  { %226 = vst [vmem:[#allocation9 + $0x8] sm:$0xff] %v223_v59 }
 0x1b4   :  { %239 = dma.vmem_to_hbm [thread:$0]  %s232_s14, 256, %s234_s16, [#allocation5], %s419_s28, %s419_s28, %s420_s29  }
 0x1b5   :  { %415 = dma.done.wait [#allocation5], 256  }
 0x1b6   :  { %416 = vsyncadd [#allocation5], 4294967040 }
 0x1b7   :  { %244 = vsyncpa [#allocation4], 1 }
 0x1b8   :  { %245 = vsyncpa [#allocation7], 1 }
 0x1b9   :  { %246 = vsyncpa [#allocation5], 1 }

</bundles_post_ra>
